<compile_context>
chip_gen: v5e
topology: v5e:2x2
jax: 0.10.0
libtpu: 0.0.40
codegen_flags: <defaults>
</compile_context>

<pallas_src>
import functools

import jax
import jax.numpy as jnp
from jax.experimental import pallas as pl
from jax.experimental.pallas import tpu as pltpu


# --------------------------- tuning constants ------------------------------
_GATHER_TOKENS_PER_STEP = 256     # row DMAs per grid step on the gather path
_MAX_FOLDED_ONEHOT_WIDTH = 1024   # only lane-fold H<128 when fold*V stays small

# Conservative (v5e-class) rates, used only by the "auto" path heuristic.
_MXU_FLOPS_PER_S = 1.8e14
_VPU_OPS_PER_S = 3.0e12
_GATHER_BYTES_PER_S = 3.0e11      # effective BW for random single-row HBM reads
_STEP_OVERHEAD_S = 3.5e-7         # per-grid-step pipeline overhead


def _round_up(a, b):
    return (a + b - 1) // b * b


def _vmem_budgets():
    """Per-generation scoped-VMEM limit and one-hot-path budget.

    ~96 MiB limit / ~80 MiB budget on v5e/v6e (128 MiB physical VMEM),
    ~48 MiB / ~40 MiB on v7x (64 MiB).  Falls back to the v7x numbers if the
    hardware query is unavailable.
    """
    try:
        cap = pltpu.get_tpu_info().vmem_capacity_bytes
    except Exception:
        cap = 64 * 1024 * 1024
    limit = (cap * 3) // 4
    budget = (limit * 5) // 6
    return limit, budget


# ---------------------------------------------------------------------------
# Path 1: one-hot matmul (table resident in VMEM, MXU does the gather)
# ---------------------------------------------------------------------------
def _onehot_kernel(idx_ref, emb_ref, out_ref, *, precision):
    """out[t] = emb[idx[t]] as a one-hot matmul on the MXU.

    idx_ref: (TN, 1)  int32 VMEM  -> broadcast compare against a lane iota, or
             (TN, VE) int32 VMEM  -> pre-expanded indices (lane-folded H<128 path)
    emb_ref: (VE, HE) VMEM, grid-invariant (single-buffered: DMA'd once)
    out_ref: (TN, HE) VMEM
    """
    tn = out_ref.shape[0]
    ve = emb_ref.shape[0]
    cols = jax.lax.broadcasted_iota(jnp.int32, (tn, ve), 1)
    onehot = (cols == idx_ref[...]).astype(emb_ref.dtype)
    out_ref[...] = jnp.dot(
        onehot, emb_ref[...],
        preferred_element_type=jnp.float32, precision=precision,
    ).astype(out_ref.dtype)


def _onehot_pallas_call(idx_in, table, tile_rows, precision, vmem_limit):
    r_pad, idx_w = idx_in.shape
    v_eff, h_eff = table.shape
    kernel = functools.partial(_onehot_kernel, precision=precision)

    def call(table_spec):
        return pl.pallas_call(
            kernel,
            out_shape=jax.ShapeDtypeStruct((r_pad, h_eff), table.dtype),
            grid=(r_pad // tile_rows,),
            in_specs=[pl.BlockSpec((tile_rows, idx_w), lambda i: (i, 0)),
                      table_spec],
            out_specs=pl.BlockSpec((tile_rows, h_eff), lambda i: (i, 0)),
            compiler_params=pltpu.CompilerParams(
                dimension_semantics=("parallel",),
                vmem_limit_bytes=vmem_limit),
        )(idx_in, table)

    try:
        # Grid-invariant table: single-buffer it so the pipeline neither
        # re-fetches it nor wastes a second table-sized VMEM buffer (matters
        # most within v7x's 64 MiB VMEM).
        return call(pl.BlockSpec((v_eff, h_eff), lambda i: (0, 0),
                                 pipeline_mode=pl.Buffered(1)))
    except Exception:
        # Older Pallas/Mosaic versions may reject pipeline_mode on the main
        # pipeline; fall back to the default double buffer (correct, 2x VMEM).
        return call(pl.BlockSpec((v_eff, h_eff), lambda i: (0, 0)))


def _embedding_onehot(idx_flat, emb_weight, fold, tile_rows, precision, vmem_limit):
    v, h = emb_weight.shape
    n = idx_flat.shape[0]

    if fold > 1:
        # Lane-dense H<128 path: pack `fold = 128//H` tokens per output row.
        # Token j of a folded row selects block j of the block-diagonal table
        # kron(I_fold, E); shift its index by j*V and replicate it across that
        # block's V lanes so the kernel's plain `col == idx` compare builds the
        # block one-hot directly -> unmasked 128-lane stores, no in-kernel
        # relayout.  All of this is wrapper-side preprocessing.
        r_pad = _round_up(max(pl.cdiv(n, fold), tile_rows), tile_rows)
        n_pad = r_pad * fold
        idx_padded = jnp.pad(idx_flat, (0, n_pad - n))
        shifted = (idx_padded.reshape(r_pad, fold)
                   + jnp.arange(fold, dtype=jnp.int32) * v)
        idx_in = jnp.repeat(shifted, v, axis=1)                 # (r_pad, fold*V)
        table = jnp.kron(jnp.eye(fold, dtype=emb_weight.dtype), emb_weight)
    else:
        r_pad = _round_up(max(n, tile_rows), tile_rows)
        n_pad = r_pad
        idx_in = jnp.pad(idx_flat, (0, n_pad - n)).reshape(r_pad, 1)
        table = emb_weight

    out = _onehot_pallas_call(idx_in, table, tile_rows, precision, vmem_limit)
    return out.reshape(n_pad, h)[:n]


# ---------------------------------------------------------------------------
# Path 2: scalar-prefetch + per-row DMA gather (table stays in HBM)
# ---------------------------------------------------------------------------
def _gather_kernel(idx_ref, emb_hbm_ref, out_ref, copy_sem):
    """DMA-gather `tok` table rows (HBM -> the VMEM output block) per grid step.

    idx_ref:     (n_pad,) int32 SMEM (scalar-prefetched)
    emb_hbm_ref: (V, H)   table left in HBM (memory_space=pl.ANY)
    out_ref:     (TOK, H) VMEM output block (rows written directly by DMA)
    copy_sem:    single DMA semaphore shared by all row copies
    """
    tok = out_ref.shape[0]
    base = pl.program_id(0) * tok

    def start_row(t, carry):
        pltpu.make_async_copy(
            emb_hbm_ref.at[idx_ref[base + t]], out_ref.at[t], copy_sem
        ).start()
        return carry

    # Issue every row DMA first so ~tok copies are in flight at once.
    jax.lax.fori_loop(0, tok, start_row, 0, unroll=8)

    # All rows are the same size, so draining the shared semaphore with `tok`
    # fixed-shape waits completes exactly when every row has landed.  No SMEM
    # index re-reads here (.wait() breaks sst->sld forwarding).
    def wait_row(t, carry):
        pltpu.make_async_copy(emb_hbm_ref.at[0], out_ref.at[0], copy_sem).wait()
        return carry

    jax.lax.fori_loop(0, tok, wait_row, 0, unroll=8)


def _embedding_gather(idx_flat, emb_weight, tok, vmem_limit):
    v, h = emb_weight.shape
    n = idx_flat.shape[0]
    n_pad = _round_up(max(n, tok), tok)
    idx_padded = jnp.pad(idx_flat, (0, n_pad - n))
    # TODO(synk): mask DMAs for padded tokens in the last block (dead work only).

    grid_spec = pltpu.PrefetchScalarGridSpec(
        num_scalar_prefetch=1,
        grid=(n_pad // tok,),
        in_specs=[pl.BlockSpec(memory_space=pl.ANY)],   # table stays off-chip
        out_specs=pl.BlockSpec((tok, h), lambda i, idx: (i, 0)),
        scratch_shapes=[pltpu.SemaphoreType.DMA],
    )
    out = pl.pallas_call(
        _gather_kernel,
        out_shape=jax.ShapeDtypeStruct((n_pad, h), emb_weight.dtype),
        grid_spec=grid_spec,
        compiler_params=pltpu.CompilerParams(
            dimension_semantics=("parallel",),
            vmem_limit_bytes=vmem_limit),
    )(idx_padded, emb_weight)
    return out[:n]


# ---------------------------------------------------------------------------
# Public wrapper (equivalent of EmbeddingEncoder.forward)
# ---------------------------------------------------------------------------
def embedding_encoder(x, emb_weight, *, method="auto"):
    """Pallas equivalent of `nn.Embedding(in_channels, hidden_channels)(x)`.

    x:          integer tensor of arbitrary shape (vocab indices).
    emb_weight: (in_channels, hidden_channels) embedding table (f32 or bf16).
    method:     "auto" | "onehot" | "gather".
    returns:    (*x.shape, hidden_channels), dtype of emb_weight.
    """
    v, h = emb_weight.shape
    itemsize = jnp.dtype(emb_weight.dtype).itemsize
    # nn.Embedding assumes in-range indices; clamp so a bad index can never
    # drive an out-of-bounds DMA (documented deviation from torch's error).
    idx_flat = jnp.clip(x.reshape(-1).astype(jnp.int32), 0, v - 1)
    n = idx_flat.shape[0]

    vmem_limit, vmem_budget = _vmem_budgets()

    # MXU handles an f32 table via multi-pass bf16; request the highest
    # precision so one-hot @ table reproduces the rows at ~f32 fidelity.
    precision = (jax.lax.Precision.HIGHEST
                 if emb_weight.dtype == jnp.float32 else jax.lax.Precision.DEFAULT)

    # Lane-dense folding for H < 128 (only when the folded one-hot stays cheap).
    fold = 1
    if h < 128 and 128 % h == 0 and v * (128 // h) <= _MAX_FOLDED_ONEHOT_WIDTH:
        fold = 128 // h
    v_eff, h_eff = fold * v, fold * h
    rows = pl.cdiv(n, fold)
    # Big tiles amortize the ~0.35us/step overhead; cap at 256 rows and split
    # into >=2 grid steps as soon as possible so v7x's two TCs both get work.
    tile_rows = min(256, max(8, _round_up(pl.cdiv(rows, 2), 8)))

    # Gather-path token block: large enough to amortize step overhead and keep
    # O(100) row DMAs in flight, small enough to stay well inside VMEM.
    tok = min(_GATHER_TOKENS_PER_STEP, max(8, _round_up(n, 8)))
    while tok > 8 and 2 * tok * h * itemsize > max(vmem_budget // 4, 1 << 20):
        tok //= 2

    if method == "auto":
        est_vmem = (
            v_eff * h_eff * itemsize                             # table (single-buffered)
            + 2 * tile_rows * h_eff * itemsize                   # output blocks
            + 2 * tile_rows * (v_eff if fold > 1 else 128) * 4   # index blocks
            + tile_rows * v_eff * 4                              # one-hot intermediate
            + tile_rows * h_eff * 4                              # f32 matmul result
        )
        # Compute-aware cutoff: large-V/small-H one-hot loses to an HBM gather
        # well before VMEM runs out, especially on v5e's weaker MXU.
        onehot_cost = (
            pl.cdiv(max(rows, tile_rows), tile_rows) * _STEP_OVERHEAD_S
            + rows * v_eff * (3.0 / _VPU_OPS_PER_S + 2.0 * h_eff / _MXU_FLOPS_PER_S))
        gather_cost = (
            pl.cdiv(max(n, tok), tok) * _STEP_OVERHEAD_S
            + n * h * itemsize / _GATHER_BYTES_PER_S)
        method = ("onehot"
                  if est_vmem <= vmem_budget and onehot_cost <= gather_cost
                  else "gather")

    if method == "onehot":
        out = _embedding_onehot(idx_flat, emb_weight, fold, tile_rows,
                                precision, vmem_limit)
    elif method == "gather":
        out = _embedding_gather(idx_flat, emb_weight, tok, vmem_limit)
    else:
        raise ValueError(f"unknown method: {method!r}")
    return out.reshape(*x.shape, h)


if __name__ == "__main__":
    key = jax.random.PRNGKey(0)

    def run_case(case_id, in_channels, hidden_channels, x_shape, method, dtype, exact):
        k_emb, k_idx = jax.random.split(jax.random.fold_in(key, case_id))
        # nn.Embedding default init: weight ~ N(0, 1).
        emb_weight = jax.random.normal(
            k_emb, (in_channels, hidden_channels), dtype=jnp.float32).astype(dtype)
        x = jax.random.randint(k_idx, x_shape, 0, in_channels, dtype=jnp.int32)

        out = jax.block_until_ready(embedding_encoder(x, emb_weight, method=method))
        ref = jnp.take(emb_weight, x, axis=0)

        assert out.shape == (*x_shape, hidden_channels), (case_id, out.shape)
        assert out.dtype == emb_weight.dtype, (case_id, out.dtype)
        if exact:
            assert bool(jnp.array_equal(out, ref)), f"case {case_id}: not bit-exact"
        else:
            # f32 goes through the MXU multi-pass (HIGHEST) path: near-f32 but
            # the split-and-accumulate passes are not guaranteed bit-exact, so
            # bound the error at 1e-5 (catches bf16 truncation ~1e-3 with 100x
            # margin); bf16/gather cases below assert exact equality.
            err = float(jnp.max(jnp.abs(out - ref)))
            assert err <= 1e-5, f"case {case_id}: max abs err {err}"

    # 1) Toy config (V=16, H=32): auto -> one-hot MXU path with lane folding
    #    (4 tokens per 128-lane output row -> unmasked stores).
    run_case(0, 16, 32, (2, 8), "auto", jnp.float32, exact=False)
    # 2) Lane-dense H=128, 512 tokens -> 256-row tiles, 2 parallel grid steps.
    run_case(1, 512, 128, (4, 128), "onehot", jnp.float32, exact=False)
    # 3) bf16 table: one-hot gather is bit-exact in bf16 and halves table VMEM.
    run_case(2, 256, 128, (2, 64), "onehot", jnp.bfloat16, exact=True)
    # 4) HBM-resident table + per-row DMA gather path (bit-exact copy).
    run_case(3, 512, 128, (2, 64), "gather", jnp.float32, exact=True)

    print("KERNEL_OK")
</pallas_src>

<mosaic_0001>
module attributes {stable_mosaic.version = 11 : i64} {
  func.func @_onehot_kernel(%arg0: i32, %arg1: memref<8x64xi32, #tpu.memory_space<vmem>>, %arg2: memref<64x128xf32, #tpu.memory_space<vmem>>, %arg3: memref<8x128xf32, #tpu.memory_space<vmem>>) attributes {dimension_semantics = [#tpu.dimension_semantics<parallel>], iteration_bounds = array<i64: 1>, scalar_prefetch = 0 : i64, scratch_operands = 0 : i64, tpu.core_type = #tpu.core_type<tc>, window_params = [{transform_indices = @transform_0, window_bounds = array<i64: 8, 64>}, {pipeline_mode = #tpu.pipeline_mode<synchronous>, transform_indices = @transform_1, window_bounds = array<i64: 64, 128>}, {transform_indices = @transform_2, window_bounds = array<i64: 8, 128>}]} {
    %0 = tpu.iota {dimensions = array<i32: 1>} : vector<8x64xi32>
    %c0 = arith.constant 0 : index
    %c0_0 = arith.constant 0 : index
    %1 = vector.load %arg1[%c0, %c0_0] : memref<8x64xi32, #tpu.memory_space<vmem>>, vector<8x64xi32>
    %2 = arith.cmpi eq, %0, %1 : vector<8x64xi32>
    %3 = arith.extui %2 : vector<8x64xi1> to vector<8x64xi32>
    %4 = arith.sitofp %3 : vector<8x64xi32> to vector<8x64xf32>
    %c0_1 = arith.constant 0 : index
    %c0_2 = arith.constant 0 : index
    %5 = vector.load %arg2[%c0_1, %c0_2] : memref<64x128xf32, #tpu.memory_space<vmem>>, vector<64x128xf32>
    %cst = arith.constant dense<0.000000e+00> : vector<8x128xf32>
    %6 = tpu.matmul %4, %5, %cst {dimension_numbers = #tpu.dot_dimension_numbers<[1], [0], [0], [1], [0, 0, 1, 1], [], []>, precision = #tpu.contract_precision<fp32>} : vector<8x64xf32>, vector<64x128xf32>, vector<8x128xf32> -> vector<8x128xf32>
    %c0_3 = arith.constant 0 : index
    %c0_4 = arith.constant 0 : index
    %7 = vector.load %arg3[%c0_3, %c0_4] : memref<8x128xf32, #tpu.memory_space<vmem>>, vector<8x128xf32>
    tpu.vector_store %arg3[%c0_3, %c0_4], %6 {strides = array<i32>} : memref<8x128xf32, #tpu.memory_space<vmem>>, vector<8x128xf32>,
    return
  }
  func.func @transform_0(%arg0: i32) -> (i32, i32) {
    %c0_i32 = arith.constant 0 : i32
    %c0_i32_0 = arith.constant 0 : i32
    return %arg0, %c0_i32 : i32, i32
  }
  func.func @transform_1(%arg0: i32) -> (i32, i32) {
    %c0_i32 = arith.constant 0 : i32
    %c0_i32_0 = arith.constant 0 : i32
    %c0_i32_1 = arith.constant 0 : i32
    return %c0_i32, %c0_i32_0 : i32, i32
  }
  func.func @transform_2(%arg0: i32) -> (i32, i32) {
    %c0_i32 = arith.constant 0 : i32
    %c0_i32_0 = arith.constant 0 : i32
    return %arg0, %c0_i32 : i32, i32
  }
}

module attributes {stable_mosaic.version = 11 : i64} {
  func.func @_onehot_kernel(%arg0: i32, %arg1: memref<8x64xi32, #tpu.memory_space<vmem>>, %arg2: memref<64x128xf32, #tpu.memory_space<vmem>>, %arg3: memref<8x128xf32, #tpu.memory_space<vmem>>) attributes {dimension_semantics = [#tpu.dimension_semantics<parallel>], iteration_bounds = array<i64: 1>, scalar_prefetch = 0 : i64, scratch_operands = 0 : i64, tpu.core_type = #tpu.core_type<tc>, window_params = [{transform_indices = @transform_0, window_bounds = array<i64: 8, 64>}, {pipeline_mode = #tpu.pipeline_mode<synchronous>, transform_indices = @transform_1, window_bounds = array<i64: 64, 128>}, {transform_indices = @transform_2, window_bounds = array<i64: 8, 128>}]} {
    %0 = tpu.iota {dimensions = array<i32: 1>} : vector<8x64xi32>
    %c0 = arith.constant 0 : index
    %c0_0 = arith.constant 0 : index
    %1 = vector.load %arg1[%c0, %c0_0] : memref<8x64xi32, #tpu.memory_space<vmem>>, vector<8x64xi32>
    %2 = arith.cmpi eq, %0, %1 : vector<8x64xi32>
    %3 = arith.extui %2 : vector<8x64xi1> to vector<8x64xi32>
    %4 = arith.sitofp %3 : vector<8x64xi32> to vector<8x64xf32>
    %c0_1 = arith.constant 0 : index
    %c0_2 = arith.constant 0 : index
    %5 = vector.load %arg2[%c0_1, %c0_2] : memref<64x128xf32, #tpu.memory_space<vmem>>, vector<64x128xf32>
    %cst = arith.constant dense<0.000000e+00> : vector<8x128xf32>
    %6 = tpu.matmul %4, %5, %cst {dimension_numbers = #tpu.dot_dimension_numbers<[1], [0], [0], [1], [0, 0, 1, 1], [], []>, precision = #tpu.contract_precision<fp32>} : vector<8x64xf32>, vector<64x128xf32>, vector<8x128xf32> -> vector<8x128xf32>
    %c0_3 = arith.constant 0 : index
    %c0_4 = arith.constant 0 : index
    %7 = vector.load %arg3[%c0_3, %c0_4] : memref<8x128xf32, #tpu.memory_space<vmem>>, vector<8x128xf32>
    tpu.vector_store %arg3[%c0_3, %c0_4], %6 {strides = array<i32>} : memref<8x128xf32, #tpu.memory_space<vmem>>, vector<8x128xf32>,
    return
  }
  func.func @transform_0(%arg0: i32) -> (i32, i32) {
    %c0_i32 = arith.constant 0 : i32
    %c0_i32_0 = arith.constant 0 : i32
    return %arg0, %c0_i32 : i32, i32
  }
  func.func @transform_1(%arg0: i32) -> (i32, i32) {
    %c0_i32 = arith.constant 0 : i32
    %c0_i32_0 = arith.constant 0 : i32
    %c0_i32_1 = arith.constant 0 : i32
    return %c0_i32, %c0_i32_0 : i32, i32
  }
  func.func @transform_2(%arg0: i32) -> (i32, i32) {
    %c0_i32 = arith.constant 0 : i32
    %c0_i32_0 = arith.constant 0 : i32
    return %arg0, %c0_i32 : i32, i32
  }
}

</mosaic_0001>

<bundles_post_ra>
// kernel: tpu_custom_call.1
= control target key start
LH: loop header
LB: loop body
LE: loop exit
PB: predicated region body
PF: predicated region fallthrough
CT: control target
= control target key end

     0   :  { %7 = vsyncpa [#allocation3], 0  ;;  %s529_s0 = inlined_call_operand.hbm [shape: s32[8,64], index: 0, kind: input, shape index: {}]   ;;  %s530_s1 = inlined_call_operand.hbm [shape: f32[64,128], index: 1, kind: input, shape index: {}]   ;;  %s531_s2 = inlined_call_operand.hbm [shape: f32[8,128], index: 2, kind: output, shape index: {}]  }
   0x1   :  { %8 = vsyncpa [#allocation6], 0 }
   0x2   :  { %9 = vsyncpa [#allocation4], 0  ;;  %s15_s11 = sshll.u32 %s529_s0, 4  ;;  %s404_s12 = smov [#allocation2]   ;;  %s16_s11 = int_to_ptr.hbm [resolvable:$true] %s15_s11 }
   0x3   :  { %s17_s13 = sshll.u32 %s404_s12, 4  ;;  %s25_s16 = sshll.u32 %s530_s1, 4  ;;  %s18_s13 = int_to_ptr.vmem [resolvable:$true] %s17_s13  ;;  %s26_s16 = int_to_ptr.hbm [resolvable:$true] %s25_s16 }
   0x4   :  { %20 = dma.hbm_to_vmem [thread:$0]  %s16_s11, 128, %s18_s13, [#allocation3]  }
   0x5   :  { %s405_s17 = smov [#allocation5]   ;;  %s406_s19 = smov 128  }
   0x6   :  { %s27_s18 = sshll.u32 %s405_s17, 4  ;;  %s407_s20 = smov 8   ;;  %s28_s18 = int_to_ptr.vmem [resolvable:$true] %s27_s18 }
   0x7   :  { %33 = dma.hbm_to_vmem [thread:$0]  %s26_s16, 1024, %s28_s18, [#allocation6], %s406_s19, %s406_s19, %s407_s20  }
   0x8   :  { %398 = dma.done.wait [#allocation3], 128  }
   0x9   :  { %399 = vsyncadd [#allocation3], 4294967168 }
   0xa   :  { %400 = dma.done.wait [#allocation6], 1024  }
   0xb   :  { %401 = vsyncadd [#allocation6], 4294966272  ;;  %v55_v0 = vld [vmem:[#allocation5 + $0x38] sm:$0xff]  ;;  %v54_v1 = vld [vmem:[#allocation5 + $0x30] sm:$0xff]  ;;  %v42_v14 = vlaneseq  ;;  %vm56_vm0 = vcmask 523264   ;;  %v408_v42 = vmov 0.0  }
   0xc   :  { %v53_v2 = vld [vmem:[#allocation5 + $0x28] sm:$0xff]  ;;  %v431_v3 = vand.u32 4294901760, %v55_v0  ;;  %v433_v4 = vand.u32 4294901760, %v54_v1  ;;  %v52_v6 = vld [vmem:[#allocation5 + $0x20] sm:$0xff]  ;;  %v51_v7 = vld [vmem:[#allocation5 + $0x18] sm:$0xff]  ;;  %s409_s0 = smov [#allocation7]  }
   0xd   :  { %v435_v5 = vand.u32 4294901760, %v53_v2  ;;  %v50_v8 = vld [vmem:[#allocation5 + $0x10] sm:$0xff]  ;;  %v437_v9 = vand.u32 4294901760, %v52_v6  ;;  %v439_v10 = vand.u32 4294901760, %v51_v7  ;;  %v49_v12 = vld [vmem:[#allocation5 + $0x8] sm:$0xff]  ;;  %v48_v13 = vld [vmem:[#allocation5] sm:$0xff] }
   0xe   :  { %v441_v11 = vand.u32 4294901760, %v50_v8  ;;  %69 = vmatpush.msra.mxu0 %v431_v3  ;;  %v445_v15 = vsub.f32 %v55_v0, %v431_v3  ;;  %v448_v16 = vsub.f32 %v54_v1, %v433_v4  ;;  %201 = vmatpush.msra.mxu3 %v431_v3  ;;  %v454_v18 = vand.u32 4294901760, %v49_v12  ;;  %v44_v34 = vld [vmem:[#allocation2] sm:$0xff]  ;;  %s303_s1 = sshll.u32 %s409_s0, 4  ;;  %s305_s23 = sshll.u32 %s531_s2, 4  ;;  %s304_s1 = int_to_ptr.vmem [resolvable:$true] %s303_s1  ;;  %s306_s23 = int_to_ptr.hbm [resolvable:$true] %s305_s23 }
   0xf   :  { %v452_v17 = vsub.f32 %v53_v2, %v435_v5  ;;  %v457_v19 = vsub.f32 %v52_v6, %v437_v9  ;;  %v460_v20 = vsub.f32 %v51_v7, %v439_v10  ;;  %v470_v25 = vand.u32 4294901760, %v48_v13 }
  0x10   :  { %v463_v21 = vsub.f32 %v50_v8, %v441_v11  ;;  %71 = vmatpush.msra.mxu0 %v433_v4  ;;  %v103_v22 = vand.u32 4294901760, %v445_v15  ;;  %164 = vmatpush.msra.mxu2 %v445_v15  ;;  %v109_v23 = vand.u32 4294901760, %v448_v16  ;;  %v475_v27 = vsub.f32 %v49_v12, %v454_v18 }
  0x11   :  { %v115_v24 = vand.u32 4294901760, %v452_v17  ;;  %203 = vmatpush.msra.mxu3 %v433_v4  ;;  %v121_v26 = vand.u32 4294901760, %v457_v19  ;;  %v43_v28 = vand.u32 127, %v42_v14  ;;  %v127_v32 = vand.u32 4294901760, %v460_v20 }
  0x12   :  { %73 = vmatpush.msra.mxu0 %v435_v5  ;;  %v104_v29 = vsub.f32 %v445_v15, %v103_v22  ;;  %v110_v30 = vsub.f32 %v448_v16, %v109_v23  ;;  %167 = vmatpush.msra.mxu2 %v448_v16  ;;  %v133_v33 = vand.u32 4294901760, %v463_v21  ;;  %v144_v38 = vsub.f32 %v48_v13, %v470_v25 }
  0x13   :  { %v116_v31 = vsub.f32 %v452_v17, %v115_v24  ;;  %205 = vmatpush.msra.mxu3 %v435_v5  ;;  %v122_v37 = vsub.f32 %v457_v19, %v121_v26  ;;  %v128_v40 = vsub.f32 %v460_v20, %v127_v32  ;;  %v139_v41 = vand.u32 4294901760, %v475_v27 }
  0x14   :  { %v105_v35 = vand.u32 4294901760, %v104_v29  ;;  %75 = vmatpush.msra.mxu0 %v437_v9  ;;  %v111_v36 = vand.u32 4294901760, %v110_v30  ;;  %170 = vmatpush.msra.mxu2 %v452_v17  ;;  %vm45_vm1 = vcmp.eq.s32.totalorder %v43_v28, %v44_v34  ;;  %v134_v45 = vsub.f32 %v463_v21, %v133_v33 }
  0x15   :  { %207 = vmatpush.msra.mxu3 %v437_v9  ;;  %v117_v39 = vand.u32 4294901760, %v116_v31  ;;  %v316_v43 = vsel %vm45_vm1, 1.0, %v408_v42  ;;  %v123_v44 = vand.u32 4294901760, %v122_v37  ;;  %v145_v46 = vand.u32 4294901760, %v144_v38 }
  0x16   :  { %106 = vmatpush.msra.mxu1 %v105_v35  ;;  %77 = vmatpush.msra.mxu0 %v439_v10  ;;  %v58_v47 = vsel %vm56_vm0, %v316_v43, 0  ;;  %v129_v49 = vand.u32 4294901760, %v128_v40  ;;  %v140_v50 = vsub.f32 %v475_v27, %v139_v41  ;;  %v135_v52 = vand.u32 4294901760, %v134_v45 }
  0x17   :  { %173 = vmatpush.msra.mxu2 %v457_v19  ;;  %209 = vmatpush.msra.mxu3 %v439_v10  ;;  %v85_v48 = vsub.f32 %v58_v47, %v58_v47  ;;  %v146_v53 = vsub.f32 %v144_v38, %v145_v46 }
  0x18   :  { %112 = vmatpush.msra.mxu1 %v111_v36  ;;  %79 = vmatpush.msra.mxu0 %v441_v11  ;;  %v141_v55 = vand.u32 4294901760, %v140_v50 }
  0x19   :  { %176 = vmatpush.msra.mxu2 %v460_v20  ;;  %211 = vmatpush.msra.mxu3 %v441_v11  ;;  %v86_v51 = vand.u32 4294901760, %v85_v48  ;;  %v147_v57 = vand.u32 4294901760, %v146_v53 }
  0x1a   :  { %118 = vmatpush.msra.mxu1 %v117_v39  ;;  %81 = vmatpush.msra.mxu0 %v454_v18 }
  0x1b   :  { %179 = vmatpush.msra.mxu2 %v463_v21  ;;  %213 = vmatpush.msra.mxu3 %v454_v18  ;;  %v87_v54 = vsub.f32 %v85_v48, %v86_v51 }
  0x1c   :  { %124 = vmatpush.msra.mxu1 %v123_v44  ;;  %83 = vmatpush.msra.mxu0 %v470_v25 }
  0x1d   :  { %182 = vmatpush.msra.mxu2 %v475_v27  ;;  %215 = vmatpush.msra.mxu3 %v470_v25  ;;  %v88_v56 = vand.u32 4294901760, %v87_v54 }
  0x1e   :  { %234 = vmatpush.msrb.mxu0 %v103_v22  ;;  %130 = vmatpush.msra.mxu1 %v129_v49 }
  0x1f   :  { %185 = vmatpush.msra.mxu2 %v144_v38  ;;  %219 = vmatmul.f32.vlgmr.msra.gmra.mxu3 %v86_v51 }
  0x20   :  { %238 = vmatpush.msrb.mxu0 %v109_v23  ;;  %136 = vmatpush.msra.mxu1 %v135_v52 }
  0x21   :  { %188 = vmatmul.f32.vlgmr.msra.gmra.mxu2 %v85_v48  ;;  %89 = vmatmul.f32.vlgmr.msra.gmra.mxu0 %v88_v56 }
  0x22   :  { %242 = vmatpush.msrb.mxu0 %v115_v24  ;;  %142 = vmatpush.msra.mxu1 %v141_v55 }
  0x24   :  { %246 = vmatpush.msrb.mxu0 %v121_v26  ;;  %148 = vmatpush.msra.mxu1 %v147_v57 }
  0x25   :  { %317 = vmatmul.msk.f32.vlgmr.msra.gmra.mxu1 %vm56_vm0, %v316_v43 }
  0x26   :  { %277 = vmatpush.msrb.mxu1 %v431_v3  ;;  %250 = vmatpush.msrb.mxu0 %v127_v32 }
  0x28   :  { %279 = vmatpush.msrb.mxu1 %v433_v4  ;;  %254 = vmatpush.msrb.mxu0 %v133_v33 }
  0x2a   :  { %281 = vmatpush.msrb.mxu1 %v435_v5  ;;  %258 = vmatpush.msrb.mxu0 %v139_v41 }
  0x2c   :  { %283 = vmatpush.msrb.mxu1 %v437_v9  ;;  %262 = vmatpush.msrb.mxu0 %v145_v46 }
  0x2d   :  { %318 = vmatmul.msk.f32.vlgmr.msrb.gmra.mxu0 %vm56_vm0, %v316_v43 }
  0x2e   :  { %285 = vmatpush.msrb.mxu1 %v439_v10 }
  0x30   :  { %287 = vmatpush.msrb.mxu1 %v441_v11 }
  0x32   :  { %289 = vmatpush.msrb.mxu1 %v454_v18 }
  0x34   :  { %291 = vmatpush.msrb.mxu1 %v470_v25 }
  0x35   :  { %319 = vmatmul.msk.f32.vlgmr.msrb.gmra.mxu1 %vm56_vm0, %v316_v43 }
  0x9e   :  { %v90_v58 = vpop.f32.mrf.mxu0 }
  0xa2   :  { %v151_v59 = vpop.f32.mrf.mxu1  ;;  %v220_v63 = vpop.f32.mrf.mxu3 }
  0xa3   :  { %v152_v60 = vadd.f32 %v151_v59, %v90_v58 }
  0xa4   :  { %v189_v61 = vpop.f32.mrf.mxu2 }
  0xa5   :  { %v190_v62 = vadd.f32 %v189_v61, %v152_v60 }
  0xa7   :  { %v221_v0 = vadd.f32 %v220_v63, %v190_v62 }
  0xaa   :  { %v265_v1 = vpop.f32.mrf.mxu0 }
  0xab   :  { %v266_v2 = vadd.f32 %v265_v1, %v221_v0 }
  0xb2   :  { %v294_v3 = vpop.f32.mrf.mxu1 }
  0xb3   :  { %v295_v4 = vadd.f32 %v294_v3, %v266_v2 }
  0xb5   :  { %297 = vst [vmem:[#allocation7] sm:$0xff] %v295_v4 }
  0xb6   :  { %308 = dma.vmem_to_hbm [thread:$0]  %s304_s1, 128, %s306_s23, [#allocation4]  }
  0xb7   :  { %402 = dma.done.wait [#allocation4], 128  }
  0xb8   :  { %403 = vsyncadd [#allocation4], 4294967168 }
  0xb9   :  { %313 = vsyncpa [#allocation3], 1 }
  0xba   :  { %314 = vsyncpa [#allocation6], 1 }
  0xbb   :  { %315 = vsyncpa [#allocation4], 1 }

// kernel: tpu_custom_call.1
= control target key start
LH: loop header
LB: loop body
LE: loop exit
PB: predicated region body
PF: predicated region fallthrough
CT: control target
= control target key end

     0   :  { %7 = vsyncpa [#allocation3], 0  ;;  %s529_s0 = inlined_call_operand.hbm [shape: s32[8,64], index: 0, kind: input, shape index: {}]   ;;  %s530_s1 = inlined_call_operand.hbm [shape: f32[64,128], index: 1, kind: input, shape index: {}]   ;;  %s531_s2 = inlined_call_operand.hbm [shape: f32[8,128], index: 2, kind: output, shape index: {}]  }
   0x1   :  { %8 = vsyncpa [#allocation6], 0 }
   0x2   :  { %9 = vsyncpa [#allocation4], 0  ;;  %s15_s11 = sshll.u32 %s529_s0, 4  ;;  %s404_s12 = smov [#allocation2]   ;;  %s16_s11 = int_to_ptr.hbm [resolvable:$true] %s15_s11 }
   0x3   :  { %s17_s13 = sshll.u32 %s404_s12, 4  ;;  %s25_s16 = sshll.u32 %s530_s1, 4  ;;  %s18_s13 = int_to_ptr.vmem [resolvable:$true] %s17_s13  ;;  %s26_s16 = int_to_ptr.hbm [resolvable:$true] %s25_s16 }
   0x4   :  { %20 = dma.hbm_to_vmem [thread:$0]  %s16_s11, 128, %s18_s13, [#allocation3]  }
   0x5   :  { %s405_s17 = smov [#allocation5]   ;;  %s406_s19 = smov 128  }
   0x6   :  { %s27_s18 = sshll.u32 %s405_s17, 4  ;;  %s407_s20 = smov 8   ;;  %s28_s18 = int_to_ptr.vmem [resolvable:$true] %s27_s18 }
   0x7   :  { %33 = dma.hbm_to_vmem [thread:$0]  %s26_s16, 1024, %s28_s18, [#allocation6], %s406_s19, %s406_s19, %s407_s20  }
   0x8   :  { %398 = dma.done.wait [#allocation3], 128  }
   0x9   :  { %399 = vsyncadd [#allocation3], 4294967168 }
   0xa   :  { %400 = dma.done.wait [#allocation6], 1024  }
   0xb   :  { %401 = vsyncadd [#allocation6], 4294966272  ;;  %v55_v0 = vld [vmem:[#allocation5 + $0x38] sm:$0xff]  ;;  %v54_v1 = vld [vmem:[#allocation5 + $0x30] sm:$0xff]  ;;  %v42_v14 = vlaneseq  ;;  %vm56_vm0 = vcmask 523264   ;;  %v408_v42 = vmov 0.0  }
   0xc   :  { %v53_v2 = vld [vmem:[#allocation5 + $0x28] sm:$0xff]  ;;  %v431_v3 = vand.u32 4294901760, %v55_v0  ;;  %v433_v4 = vand.u32 4294901760, %v54_v1  ;;  %v52_v6 = vld [vmem:[#allocation5 + $0x20] sm:$0xff]  ;;  %v51_v7 = vld [vmem:[#allocation5 + $0x18] sm:$0xff]  ;;  %s409_s0 = smov [#allocation7]  }
   0xd   :  { %v435_v5 = vand.u32 4294901760, %v53_v2  ;;  %v50_v8 = vld [vmem:[#allocation5 + $0x10] sm:$0xff]  ;;  %v437_v9 = vand.u32 4294901760, %v52_v6  ;;  %v439_v10 = vand.u32 4294901760, %v51_v7  ;;  %v49_v12 = vld [vmem:[#allocation5 + $0x8] sm:$0xff]  ;;  %v48_v13 = vld [vmem:[#allocation5] sm:$0xff] }
   0xe   :  { %v441_v11 = vand.u32 4294901760, %v50_v8  ;;  %69 = vmatpush.msra.mxu0 %v431_v3  ;;  %v445_v15 = vsub.f32 %v55_v0, %v431_v3  ;;  %v448_v16 = vsub.f32 %v54_v1, %v433_v4  ;;  %201 = vmatpush.msra.mxu3 %v431_v3  ;;  %v454_v18 = vand.u32 4294901760, %v49_v12  ;;  %v44_v34 = vld [vmem:[#allocation2] sm:$0xff]  ;;  %s303_s1 = sshll.u32 %s409_s0, 4  ;;  %s305_s23 = sshll.u32 %s531_s2, 4  ;;  %s304_s1 = int_to_ptr.vmem [resolvable:$true] %s303_s1  ;;  %s306_s23 = int_to_ptr.hbm [resolvable:$true] %s305_s23 }
   0xf   :  { %v452_v17 = vsub.f32 %v53_v2, %v435_v5  ;;  %v457_v19 = vsub.f32 %v52_v6, %v437_v9  ;;  %v460_v20 = vsub.f32 %v51_v7, %v439_v10  ;;  %v470_v25 = vand.u32 4294901760, %v48_v13 }
  0x10   :  { %v463_v21 = vsub.f32 %v50_v8, %v441_v11  ;;  %71 = vmatpush.msra.mxu0 %v433_v4  ;;  %v103_v22 = vand.u32 4294901760, %v445_v15  ;;  %164 = vmatpush.msra.mxu2 %v445_v15  ;;  %v109_v23 = vand.u32 4294901760, %v448_v16  ;;  %v475_v27 = vsub.f32 %v49_v12, %v454_v18 }
  0x11   :  { %v115_v24 = vand.u32 4294901760, %v452_v17  ;;  %203 = vmatpush.msra.mxu3 %v433_v4  ;;  %v121_v26 = vand.u32 4294901760, %v457_v19  ;;  %v43_v28 = vand.u32 127, %v42_v14  ;;  %v127_v32 = vand.u32 4294901760, %v460_v20 }
  0x12   :  { %73 = vmatpush.msra.mxu0 %v435_v5  ;;  %v104_v29 = vsub.f32 %v445_v15, %v103_v22  ;;  %v110_v30 = vsub.f32 %v448_v16, %v109_v23  ;;  %167 = vmatpush.msra.mxu2 %v448_v16  ;;  %v133_v33 = vand.u32 4294901760, %v463_v21  ;;  %v144_v38 = vsub.f32 %v48_v13, %v470_v25 }
  0x13   :  { %v116_v31 = vsub.f32 %v452_v17, %v115_v24  ;;  %205 = vmatpush.msra.mxu3 %v435_v5  ;;  %v122_v37 = vsub.f32 %v457_v19, %v121_v26  ;;  %v128_v40 = vsub.f32 %v460_v20, %v127_v32  ;;  %v139_v41 = vand.u32 4294901760, %v475_v27 }
  0x14   :  { %v105_v35 = vand.u32 4294901760, %v104_v29  ;;  %75 = vmatpush.msra.mxu0 %v437_v9  ;;  %v111_v36 = vand.u32 4294901760, %v110_v30  ;;  %170 = vmatpush.msra.mxu2 %v452_v17  ;;  %vm45_vm1 = vcmp.eq.s32.totalorder %v43_v28, %v44_v34  ;;  %v134_v45 = vsub.f32 %v463_v21, %v133_v33 }
  0x15   :  { %207 = vmatpush.msra.mxu3 %v437_v9  ;;  %v117_v39 = vand.u32 4294901760, %v116_v31  ;;  %v316_v43 = vsel %vm45_vm1, 1.0, %v408_v42  ;;  %v123_v44 = vand.u32 4294901760, %v122_v37  ;;  %v145_v46 = vand.u32 4294901760, %v144_v38 }
  0x16   :  { %106 = vmatpush.msra.mxu1 %v105_v35  ;;  %77 = vmatpush.msra.mxu0 %v439_v10  ;;  %v58_v47 = vsel %vm56_vm0, %v316_v43, 0  ;;  %v129_v49 = vand.u32 4294901760, %v128_v40  ;;  %v140_v50 = vsub.f32 %v475_v27, %v139_v41  ;;  %v135_v52 = vand.u32 4294901760, %v134_v45 }
  0x17   :  { %173 = vmatpush.msra.mxu2 %v457_v19  ;;  %209 = vmatpush.msra.mxu3 %v439_v10  ;;  %v85_v48 = vsub.f32 %v58_v47, %v58_v47  ;;  %v146_v53 = vsub.f32 %v144_v38, %v145_v46 }
  0x18   :  { %112 = vmatpush.msra.mxu1 %v111_v36  ;;  %79 = vmatpush.msra.mxu0 %v441_v11  ;;  %v141_v55 = vand.u32 4294901760, %v140_v50 }
  0x19   :  { %176 = vmatpush.msra.mxu2 %v460_v20  ;;  %211 = vmatpush.msra.mxu3 %v441_v11  ;;  %v86_v51 = vand.u32 4294901760, %v85_v48  ;;  %v147_v57 = vand.u32 4294901760, %v146_v53 }
  0x1a   :  { %118 = vmatpush.msra.mxu1 %v117_v39  ;;  %81 = vmatpush.msra.mxu0 %v454_v18 }
  0x1b   :  { %179 = vmatpush.msra.mxu2 %v463_v21  ;;  %213 = vmatpush.msra.mxu3 %v454_v18  ;;  %v87_v54 = vsub.f32 %v85_v48, %v86_v51 }
  0x1c   :  { %124 = vmatpush.msra.mxu1 %v123_v44  ;;  %83 = vmatpush.msra.mxu0 %v470_v25 }
  0x1d   :  { %182 = vmatpush.msra.mxu2 %v475_v27  ;;  %215 = vmatpush.msra.mxu3 %v470_v25  ;;  %v88_v56 = vand.u32 4294901760, %v87_v54 }
  0x1e   :  { %234 = vmatpush.msrb.mxu0 %v103_v22  ;;  %130 = vmatpush.msra.mxu1 %v129_v49 }
  0x1f   :  { %185 = vmatpush.msra.mxu2 %v144_v38  ;;  %219 = vmatmul.f32.vlgmr.msra.gmra.mxu3 %v86_v51 }
  0x20   :  { %238 = vmatpush.msrb.mxu0 %v109_v23  ;;  %136 = vmatpush.msra.mxu1 %v135_v52 }
  0x21   :  { %188 = vmatmul.f32.vlgmr.msra.gmra.mxu2 %v85_v48  ;;  %89 = vmatmul.f32.vlgmr.msra.gmra.mxu0 %v88_v56 }
  0x22   :  { %242 = vmatpush.msrb.mxu0 %v115_v24  ;;  %142 = vmatpush.msra.mxu1 %v141_v55 }
  0x24   :  { %246 = vmatpush.msrb.mxu0 %v121_v26  ;;  %148 = vmatpush.msra.mxu1 %v147_v57 }
  0x25   :  { %317 = vmatmul.msk.f32.vlgmr.msra.gmra.mxu1 %vm56_vm0, %v316_v43 }
  0x26   :  { %277 = vmatpush.msrb.mxu1 %v431_v3  ;;  %250 = vmatpush.msrb.mxu0 %v127_v32 }
  0x28   :  { %279 = vmatpush.msrb.mxu1 %v433_v4  ;;  %254 = vmatpush.msrb.mxu0 %v133_v33 }
  0x2a   :  { %281 = vmatpush.msrb.mxu1 %v435_v5  ;;  %258 = vmatpush.msrb.mxu0 %v139_v41 }
  0x2c   :  { %283 = vmatpush.msrb.mxu1 %v437_v9  ;;  %262 = vmatpush.msrb.mxu0 %v145_v46 }
  0x2d   :  { %318 = vmatmul.msk.f32.vlgmr.msrb.gmra.mxu0 %vm56_vm0, %v316_v43 }
  0x2e   :  { %285 = vmatpush.msrb.mxu1 %v439_v10 }
  0x30   :  { %287 = vmatpush.msrb.mxu1 %v441_v11 }
  0x32   :  { %289 = vmatpush.msrb.mxu1 %v454_v18 }
  0x34   :  { %291 = vmatpush.msrb.mxu1 %v470_v25 }
  0x35   :  { %319 = vmatmul.msk.f32.vlgmr.msrb.gmra.mxu1 %vm56_vm0, %v316_v43 }
  0x9e   :  { %v90_v58 = vpop.f32.mrf.mxu0 }
  0xa2   :  { %v151_v59 = vpop.f32.mrf.mxu1  ;;  %v220_v63 = vpop.f32.mrf.mxu3 }
  0xa3   :  { %v152_v60 = vadd.f32 %v151_v59, %v90_v58 }
  0xa4   :  { %v189_v61 = vpop.f32.mrf.mxu2 }
  0xa5   :  { %v190_v62 = vadd.f32 %v189_v61, %v152_v60 }
  0xa7   :  { %v221_v0 = vadd.f32 %v220_v63, %v190_v62 }
  0xaa   :  { %v265_v1 = vpop.f32.mrf.mxu0 }
  0xab   :  { %v266_v2 = vadd.f32 %v265_v1, %v221_v0 }
  0xb2   :  { %v294_v3 = vpop.f32.mrf.mxu1 }
  0xb3   :  { %v295_v4 = vadd.f32 %v294_v3, %v266_v2 }
  0xb5   :  { %297 = vst [vmem:[#allocation7] sm:$0xff] %v295_v4 }
  0xb6   :  { %308 = dma.vmem_to_hbm [thread:$0]  %s304_s1, 128, %s306_s23, [#allocation4]  }
  0xb7   :  { %402 = dma.done.wait [#allocation4], 128  }
  0xb8   :  { %403 = vsyncadd [#allocation4], 4294967168 }
  0xb9   :  { %313 = vsyncpa [#allocation3], 1 }
  0xba   :  { %314 = vsyncpa [#allocation6], 1 }
  0xbb   :  { %315 = vsyncpa [#allocation4], 1 }

</bundles_post_ra>
